<compile_context>
chip_gen: v7x
topology: tpu7x:2x2x1
jax: 0.10.0
libtpu: 0.0.40
codegen_flags: <defaults>
</compile_context>

<pallas_src>
import numpy as np
import jax
import jax.numpy as jnp
from jax.experimental import pallas as pl
from jax.experimental.pallas import tpu as pltpu


# ---------------------------------------------------------------------------
# Kernel 1: hop-1 embedding h1 = tanh(feat @ W1a + (mean_nbr feat) @ W1b + b1)
# for all nodes.  Grid = (rows, k); k is the contraction over neighbors.
# ---------------------------------------------------------------------------
def _h1_kernel(a_ref, featk_ref, featrow_ref, invdeg_ref,
               w1a_ref, w1b_ref, b1_ref, h1_ref, acc_ref):
    k = pl.program_id(1)

    @pl.when(k == 0)
    def _init():
        acc_ref[...] = jnp.zeros_like(acc_ref)

    # (tm, tk) {0,1} bf16 mask @ (tk, Dp) bf16 feat -> f32 accumulate (MXU)
    acc_ref[...] += jnp.dot(a_ref[...], featk_ref[...],
                            preferred_element_type=jnp.float32)

    @pl.when(k == pl.num_programs(1) - 1)
    def _finalize():
        means1 = acc_ref[...] * invdeg_ref[...]          # (tm, Dp) * (tm, 1)
        h = (jnp.dot(featrow_ref[...], w1a_ref[...],
                     preferred_element_type=jnp.float32)
             + jnp.dot(means1, w1b_ref[...],
                       preferred_element_type=jnp.float32)
             + b1_ref[...])
        h1_ref[...] = jnp.tanh(h).astype(h1_ref.dtype)   # bf16, lane-dense store


# ---------------------------------------------------------------------------
# Kernel 2: hop-2 embedding + L2 normalize for a batch of gathered rows.
# Grid = (batch tiles, k); k is the contraction over neighbors (h1 K-tiled).
# ---------------------------------------------------------------------------
def _embed_kernel(maskb_ref, h1k_ref, featb_ref, invdegb_ref,
                  w2a_ref, w2b_ref, b2_ref, out_ref, acc_ref):
    k = pl.program_id(1)

    @pl.when(k == 0)
    def _init():
        acc_ref[...] = jnp.zeros_like(acc_ref)

    # (bm, tk) bf16 gathered mask rows @ (tk, Dp) bf16 h1 -> f32 accumulate
    acc_ref[...] += jnp.dot(maskb_ref[...], h1k_ref[...],
                            preferred_element_type=jnp.float32)

    @pl.when(k == pl.num_programs(1) - 1)
    def _finalize():
        means2 = acc_ref[...] * invdegb_ref[...]         # (bm, Dp) * (bm, 1)
        out = (jnp.dot(featb_ref[...], w2a_ref[...],
                       preferred_element_type=jnp.float32)
               + jnp.dot(means2, w2b_ref[...],
                         preferred_element_type=jnp.float32)
               + b2_ref[...])                            # (bm, Op)
        # F.normalize(out, dim=1): x / max(||x||, 1e-12)  (padded cols are 0)
        sumsq = jnp.sum(out * out, axis=-1, keepdims=True)
        out_ref[...] = out * (1.0 / jnp.maximum(jnp.sqrt(sumsq), 1e-12))


# ---------------------------------------------------------------------------
# Host helpers
# ---------------------------------------------------------------------------
def _round_up(x, m):
    return ((x + m - 1) // m) * m


def _pick_tile(dim, target, mult):
    """Largest tile <= target that is a multiple of `mult` and divides `dim`."""
    t = min(target, dim)
    t = max(mult, (t // mult) * mult)
    while dim % t:
        t -= mult
    return t


def _pad2(x, rows, cols):
    x = np.asarray(x, np.float32)
    return np.pad(x, ((0, rows - x.shape[0]), (0, cols - x.shape[1])))


def _build_graph_arrays(adj_lists, num_nodes):
    """{0,1} adjacency mask + 1/degree (zero-degree guarded, no NaNs)."""
    mask = np.zeros((num_nodes, num_nodes), np.float32)
    deg = np.zeros((num_nodes,), np.float32)
    for v in range(num_nodes):
        nbrs = list(adj_lists[v])
        deg[v] = len(nbrs)
        if nbrs:
            mask[v, nbrs] = 1.0
    inv_deg = 1.0 / np.maximum(deg, 1.0)
    return mask, inv_deg


def graphsage_embed(mask_np, inv_deg_np, feat_np, idx_np, params, *,
                    tm_target=256, tk_target=512, bm_target=128,
                    vmem_limit_bytes=48 * 1024 * 1024):
    """2-hop GraphSAGE embedding for the nodes in idx_np (two Pallas calls).

    Defaults fit v7x's 64 MiB VMEM with headroom; since the kernels are
    K-tiled the footprint is a few MiB, so the same tiles also run well on
    v5e/v6e (raise tm_target/tk_target toward 512/1024 there if desired).
    """
    w1a, w1b, b1, w2a, w2b, b2 = params
    N, D = feat_np.shape
    O = np.asarray(w2a).shape[1]
    B = int(idx_np.shape[0])

    # Lane-dense padding (feature dims -> multiples of 128; rows -> tileable).
    Np = _round_up(N, 128)
    Dp = _round_up(max(D, 128), 128)
    Op = _round_up(max(O, 128), 128)
    Bp = _round_up(max(B, 16), 16)

    # Padded device arrays.  The adjacency mask is exact {0,1} in bf16.
    mask_bf16 = jnp.asarray(_pad2(mask_np, Np, Np), jnp.bfloat16)
    feat_f32 = jnp.asarray(_pad2(feat_np, Np, Dp), jnp.float32)
    feat_bf16 = feat_f32.astype(jnp.bfloat16)
    inv_deg = jnp.asarray(
        np.pad(np.asarray(inv_deg_np, np.float32), (0, Np - N)).reshape(Np, 1))

    w1a_p = jnp.asarray(_pad2(w1a, Dp, Dp))
    w1b_p = jnp.asarray(_pad2(w1b, Dp, Dp))
    b1_p = jnp.asarray(_pad2(b1, 1, Dp))
    w2a_p = jnp.asarray(_pad2(w2a, Dp, Op))
    w2b_p = jnp.asarray(_pad2(w2b, Dp, Op))
    b2_p = jnp.asarray(_pad2(b2, 1, Op))

    # Tile sizes that exactly divide the padded dims (no ragged tiles).
    tm = _pick_tile(Np, tm_target, 16)     # row tile (bf16 sublane-safe)
    tk = _pick_tile(Np, tk_target, 128)    # contraction tile (lane-aligned)
    bm = _pick_tile(Bp, bm_target, 16)     # batch tile for kernel 2

    # ---- call 1: h1 for all nodes (bf16 out), K-tiled A @ feat ----
    h1 = pl.pallas_call(
        _h1_kernel,
        out_shape=jax.ShapeDtypeStruct((Np, Dp), jnp.bfloat16),
        grid_spec=pltpu.PrefetchScalarGridSpec(
            num_scalar_prefetch=0,
            grid=(Np // tm, Np // tk),
            in_specs=[
                pl.BlockSpec((tm, tk), lambda i, k: (i, k)),   # A mask tile
                pl.BlockSpec((tk, Dp), lambda i, k: (k, 0)),   # feat K-tile
                pl.BlockSpec((tm, Dp), lambda i, k: (i, 0)),   # feat rows (self term)
                pl.BlockSpec((tm, 1), lambda i, k: (i, 0)),    # 1/deg rows
                pl.BlockSpec((Dp, Dp), lambda i, k: (0, 0)),   # W1 (self)
                pl.BlockSpec((Dp, Dp), lambda i, k: (0, 0)),   # W1 (neighbor mean)
                pl.BlockSpec((1, Dp), lambda i, k: (0, 0)),    # b1
            ],
            out_specs=pl.BlockSpec((tm, Dp), lambda i, k: (i, 0)),
            scratch_shapes=[pltpu.VMEM((tm, Dp), jnp.float32)],
        ),
        compiler_params=pltpu.CompilerParams(
            dimension_semantics=("parallel", "arbitrary"),
            vmem_limit_bytes=vmem_limit_bytes,
        ),
    )(mask_bf16, feat_bf16, feat_f32, inv_deg, w1a_p, w1b_p, b1_p)

    # ---- gather the batch rows (small: B x Np), then call 2 in bm-row tiles ----
    idx_pad = np.zeros((Bp,), np.int32)
    idx_pad[:B] = np.asarray(idx_np, np.int32)
    idx_dev = jnp.asarray(idx_pad)
    mask_b = jnp.take(mask_bf16, idx_dev, axis=0)    # (Bp, Np) bf16
    feat_b = jnp.take(feat_f32, idx_dev, axis=0)     # (Bp, Dp) f32
    invd_b = jnp.take(inv_deg, idx_dev, axis=0)      # (Bp, 1)  f32

    out = pl.pallas_call(
        _embed_kernel,
        out_shape=jax.ShapeDtypeStruct((Bp, Op), jnp.float32),
        grid_spec=pltpu.PrefetchScalarGridSpec(
            num_scalar_prefetch=0,
            grid=(Bp // bm, Np // tk),
            in_specs=[
                pl.BlockSpec((bm, tk), lambda b, k: (b, k)),   # gathered mask rows
                pl.BlockSpec((tk, Dp), lambda b, k: (k, 0)),   # h1 K-tile (bf16)
                pl.BlockSpec((bm, Dp), lambda b, k: (b, 0)),   # gathered feat rows
                pl.BlockSpec((bm, 1), lambda b, k: (b, 0)),    # gathered 1/deg
                pl.BlockSpec((Dp, Op), lambda b, k: (0, 0)),   # W2 (self)
                pl.BlockSpec((Dp, Op), lambda b, k: (0, 0)),   # W2 (neighbor mean)
                pl.BlockSpec((1, Op), lambda b, k: (0, 0)),    # b2
            ],
            out_specs=pl.BlockSpec((bm, Op), lambda b, k: (b, 0)),
            scratch_shapes=[pltpu.VMEM((bm, Dp), jnp.float32)],
        ),
        compiler_params=pltpu.CompilerParams(
            dimension_semantics=("parallel", "arbitrary"),
            vmem_limit_bytes=vmem_limit_bytes,
        ),
    )(mask_b, h1, feat_b, invd_b, w2a_p, w2b_p, b2_p)

    return out[:B, :O]


def fixed_unigram_candidate_sampler(num_sampled, unique, range_max, distortion,
                                    unigrams, rng):
    weights = np.asarray(unigrams, dtype=np.float64) ** distortion
    prob = weights / weights.sum()
    return rng.choice(range_max, num_sampled, p=prob, replace=not unique)


def unsupervised_graphsage_forward(inputs1, inputs2, adj_lists, degrees, feat,
                                   params, rng, neg_sample_size=10, **tile_kw):
    """Mirrors UnsupervisedGraphSage.forward (normalize_embedding=True)."""
    N = np.asarray(feat).shape[0]
    neg = fixed_unigram_candidate_sampler(
        num_sampled=neg_sample_size, unique=False, range_max=len(degrees),
        distortion=0.75, unigrams=np.asarray(degrees), rng=rng)

    # TODO(synk): the python set/dict adjacency walk of aggregator() has no
    # Pallas equivalent; it is encoded host-side as a dense {0,1} mask + 1/deg.
    mask_np, inv_deg_np = _build_graph_arrays(adj_lists, N)

    n1, n2 = len(inputs1), len(inputs2)
    idx = np.concatenate([np.asarray(inputs1), np.asarray(inputs2),
                          np.asarray(neg)]).astype(np.int32)

    out = graphsage_embed(mask_np, inv_deg_np, np.asarray(feat, np.float32),
                          idx, params, **tile_kw)
    return out[:n1], out[n1:n1 + n2], out[n1 + n2:]


def _reference_embed(mask_np, inv_deg_np, feat_np, idx_np, params):
    """Pure-f32 dense reference of the same formulation (no bf16 matching)."""
    w1a, w1b, b1, w2a, w2b, b2 = params
    mask = jnp.asarray(mask_np, jnp.float32)
    inv_deg = jnp.asarray(inv_deg_np, jnp.float32).reshape(-1, 1)
    feat = jnp.asarray(feat_np, jnp.float32)
    means1 = (mask @ feat) * inv_deg
    h1 = jnp.tanh(feat @ w1a + means1 @ w1b + b1)
    idx = jnp.asarray(np.asarray(idx_np, np.int32))
    means2 = (mask[idx] @ h1) * inv_deg[idx]
    out = feat[idx] @ w2a + means2 @ w2b + b2
    nrm = jnp.sqrt(jnp.sum(out * out, axis=1, keepdims=True))
    return out / jnp.maximum(nrm, 1e-12)


if __name__ == "__main__":
    # small shapes consistent with the module: N nodes, input_dim=D, output_dim=O
    N, D, O, B = 64, 32, 16, 8

    key = jax.random.PRNGKey(0)
    k_feat, k_w1, k_b1, k_w2, k_b2 = jax.random.split(key, 5)

    feat = jax.random.normal(k_feat, (N, D), jnp.float32)

    # nn.Linear(2D, D) and nn.Linear(2D, O): PyTorch-style uniform init bounds
    bound = 1.0 / np.sqrt(2 * D)
    W1 = jax.random.uniform(k_w1, (D, 2 * D), jnp.float32, -bound, bound)   # linear1.weight
    b1 = jax.random.uniform(k_b1, (D,), jnp.float32, -bound, bound)         # linear1.bias
    W2 = jax.random.uniform(k_w2, (O, 2 * D), jnp.float32, -bound, bound)   # linear2.weight
    b2 = jax.random.uniform(k_b2, (O,), jnp.float32, -bound, bound)         # linear2.bias

    # split concat-weights and pre-transpose so the kernels do x @ W
    params = (
        jnp.transpose(W1[:, :D]),        # applied to feat      (D, D)
        jnp.transpose(W1[:, D:]),        # applied to means1    (D, D)
        b1.reshape(1, D),
        jnp.transpose(W2[:, :D]),        # applied to feat      (D, O)
        jnp.transpose(W2[:, D:]),        # applied to means2    (D, O)
        b2.reshape(1, O),
    )

    # deterministic synthetic graph: ring + a few random extra edges
    rng = np.random.default_rng(0)
    adj_lists = {v: {(v + 1) % N, (v - 1) % N} for v in range(N)}
    extra = rng.integers(0, N, size=(N,))
    for v in range(N):
        u = int(extra[v])
        if u != v:
            adj_lists[v].add(u)
            adj_lists[u].add(v)
    degrees = np.array([len(adj_lists[v]) for v in range(N)], dtype=np.float64)

    inputs1 = rng.integers(0, N, size=(B,))
    inputs2 = rng.integers(0, N, size=(B,))

    # run the Pallas forward
    o1, o2, on = unsupervised_graphsage_forward(
        inputs1, inputs2, adj_lists, degrees, feat, params, rng)
    jax.block_until_ready((o1, o2, on))

    # check against a pure-f32 dense reference (tolerance covers the bf16
    # feat / h1 casts on the kernel side and MXU accumulation order).
    mask_np, inv_deg_np = _build_graph_arrays(adj_lists, N)
    feat_np = np.asarray(feat, np.float32)
    ref1 = _reference_embed(mask_np, inv_deg_np, feat_np, inputs1, params)
    ref2 = _reference_embed(mask_np, inv_deg_np, feat_np, inputs2, params)
    np.testing.assert_allclose(np.asarray(o1), np.asarray(ref1), rtol=2e-2, atol=2e-2)
    np.testing.assert_allclose(np.asarray(o2), np.asarray(ref2), rtol=2e-2, atol=2e-2)
    # all three outputs must be unit-norm rows (F.normalize semantics)
    for o in (o1, o2, on):
        np.testing.assert_allclose(np.linalg.norm(np.asarray(o), axis=1), 1.0, atol=1e-3)

    print("KERNEL_OK")
</pallas_src>

<mosaic_0001>
module attributes {stable_mosaic.version = 11 : i64} {
  func.func @_h1_kernel(%arg0: i32, %arg1: i32, %arg2: memref<128x128xbf16, #tpu.memory_space<vmem>>, %arg3: memref<128x128xbf16, #tpu.memory_space<vmem>>, %arg4: memref<128x128xf32, #tpu.memory_space<vmem>>, %arg5: memref<128x1xf32, #tpu.memory_space<vmem>>, %arg6: memref<128x128xf32, #tpu.memory_space<vmem>>, %arg7: memref<128x128xf32, #tpu.memory_space<vmem>>, %arg8: memref<1x128xf32, #tpu.memory_space<vmem>>, %arg9: memref<128x128xbf16, #tpu.memory_space<vmem>>, %arg10: memref<128x128xf32, #tpu.memory_space<vmem>>) attributes {dimension_semantics = [#tpu.dimension_semantics<parallel>, #tpu.dimension_semantics<arbitrary>], iteration_bounds = array<i64: 1, 1>, scalar_prefetch = 0 : i64, scratch_operands = 1 : i64, tpu.core_type = #tpu.core_type<tc>, window_params = [{transform_indices = @transform_0, window_bounds = array<i64: 128, 128>}, {transform_indices = @transform_1, window_bounds = array<i64: 128, 128>}, {transform_indices = @transform_2, window_bounds = array<i64: 128, 128>}, {transform_indices = @transform_3, window_bounds = array<i64: 128, 1>}, {pipeline_mode = #tpu.pipeline_mode<synchronous>, transform_indices = @transform_4, window_bounds = array<i64: 128, 128>}, {pipeline_mode = #tpu.pipeline_mode<synchronous>, transform_indices = @transform_5, window_bounds = array<i64: 128, 128>}, {pipeline_mode = #tpu.pipeline_mode<synchronous>, transform_indices = @transform_6, window_bounds = array<i64: 1, 128>}, {transform_indices = @transform_7, window_bounds = array<i64: 128, 128>}]} {
    %c0_i32 = arith.constant 0 : i32
    %0 = arith.cmpi eq, %arg1, %c0_i32 : i32
    %1 = arith.extui %0 : i1 to i32
    %c0_i32_0 = arith.constant 0 : i32
    %2 = arith.cmpi ne, %1, %c0_i32_0 : i32
    scf.if %2 {
      %cst_10 = arith.constant 0.000000e+00 : f32
      %12 = vector.broadcast %cst_10 : f32 to vector<128x128xf32>
      %c0_11 = arith.constant 0 : index
      %c0_12 = arith.constant 0 : index
      %13 = vector.load %arg10[%c0_11, %c0_12] : memref<128x128xf32, #tpu.memory_space<vmem>>, vector<128x128xf32>
      tpu.vector_store %arg10[%c0_11, %c0_12], %12 {strides = array<i32>} : memref<128x128xf32, #tpu.memory_space<vmem>>, vector<128x128xf32>,
    } else {
    }
    %c0 = arith.constant 0 : index
    %c0_1 = arith.constant 0 : index
    %3 = vector.load %arg10[%c0, %c0_1] : memref<128x128xf32, #tpu.memory_space<vmem>>, vector<128x128xf32>
    %c0_2 = arith.constant 0 : index
    %c0_3 = arith.constant 0 : index
    %4 = vector.load %arg2[%c0_2, %c0_3] : memref<128x128xbf16, #tpu.memory_space<vmem>>, vector<128x128xbf16>
    %c0_4 = arith.constant 0 : index
    %c0_5 = arith.constant 0 : index
    %5 = vector.load %arg3[%c0_4, %c0_5] : memref<128x128xbf16, #tpu.memory_space<vmem>>, vector<128x128xbf16>
    %cst = arith.constant dense<0.000000e+00> : vector<128x128xf32>
    %6 = tpu.matmul %4, %5, %cst {dimension_numbers = #tpu.dot_dimension_numbers<[1], [0], [0], [1], [0, 0, 1, 1], [], []>} : vector<128x128xbf16>, vector<128x128xbf16>, vector<128x128xf32> -> vector<128x128xf32>
    %7 = arith.addf %3, %6 : vector<128x128xf32>
    %c0_6 = arith.constant 0 : index
    %c0_7 = arith.constant 0 : index
    %8 = vector.load %arg10[%c0_6, %c0_7] : memref<128x128xf32, #tpu.memory_space<vmem>>, vector<128x128xf32>
    tpu.vector_store %arg10[%c0_6, %c0_7], %7 {strides = array<i32>} : memref<128x128xf32, #tpu.memory_space<vmem>>, vector<128x128xf32>,
    %c0_i32_8 = arith.constant 0 : i32
    %9 = arith.cmpi eq, %arg1, %c0_i32_8 : i32
    %10 = arith.extui %9 : i1 to i32
    %c0_i32_9 = arith.constant 0 : i32
    %11 = arith.cmpi ne, %10, %c0_i32_9 : i32
    scf.if %11 {
      %c0_10 = arith.constant 0 : index
      %c0_11 = arith.constant 0 : index
      %12 = vector.load %arg10[%c0_10, %c0_11] : memref<128x128xf32, #tpu.memory_space<vmem>>, vector<128x128xf32>
      %c0_12 = arith.constant 0 : index
      %c0_13 = arith.constant 0 : index
      %13 = vector.load %arg5[%c0_12, %c0_13] : memref<128x1xf32, #tpu.memory_space<vmem>>, vector<128x1xf32>
      %14 = vector.broadcast %13 : vector<128x1xf32> to vector<128x128xf32>
      %15 = arith.mulf %12, %14 : vector<128x128xf32>
      %c0_14 = arith.constant 0 : index
      %c0_15 = arith.constant 0 : index
      %16 = vector.load %arg4[%c0_14, %c0_15] : memref<128x128xf32, #tpu.memory_space<vmem>>, vector<128x128xf32>
      %c0_16 = arith.constant 0 : index
      %c0_17 = arith.constant 0 : index
      %17 = vector.load %arg6[%c0_16, %c0_17] : memref<128x128xf32, #tpu.memory_space<vmem>>, vector<128x128xf32>
      %cst_18 = arith.constant dense<0.000000e+00> : vector<128x128xf32>
      %18 = tpu.matmul %16, %17, %cst_18 {dimension_numbers = #tpu.dot_dimension_numbers<[1], [0], [0], [1], [0, 0, 1, 1], [], []>} : vector<128x128xf32>, vector<128x128xf32>, vector<128x128xf32> -> vector<128x128xf32>
      %c0_19 = arith.constant 0 : index
      %c0_20 = arith.constant 0 : index
      %19 = vector.load %arg7[%c0_19, %c0_20] : memref<128x128xf32, #tpu.memory_space<vmem>>, vector<128x128xf32>
      %cst_21 = arith.constant dense<0.000000e+00> : vector<128x128xf32>
      %20 = tpu.matmul %15, %19, %cst_21 {dimension_numbers = #tpu.dot_dimension_numbers<[1], [0], [0], [1], [0, 0, 1, 1], [], []>} : vector<128x128xf32>, vector<128x128xf32>, vector<128x128xf32> -> vector<128x128xf32>
      %21 = arith.addf %18, %20 : vector<128x128xf32>
      %c0_22 = arith.constant 0 : index
      %c0_23 = arith.constant 0 : index
      %22 = vector.load %arg8[%c0_22, %c0_23] : memref<1x128xf32, #tpu.memory_space<vmem>>, vector<1x128xf32>
      %23 = vector.broadcast %22 : vector<1x128xf32> to vector<128x128xf32>
      %24 = arith.addf %21, %23 : vector<128x128xf32>
      %25 = math.tanh %24 : vector<128x128xf32>
      %26 = arith.truncf %25 : vector<128x128xf32> to vector<128x128xbf16>
      %c0_24 = arith.constant 0 : index
      %c0_25 = arith.constant 0 : index
      %27 = vector.load %arg9[%c0_24, %c0_25] : memref<128x128xbf16, #tpu.memory_space<vmem>>, vector<128x128xbf16>
      tpu.vector_store %arg9[%c0_24, %c0_25], %26 {strides = array<i32>} : memref<128x128xbf16, #tpu.memory_space<vmem>>, vector<128x128xbf16>,
    } else {
    }
    return
  }
  func.func @transform_0(%arg0: i32, %arg1: i32) -> (i32, i32) {
    %c0_i32 = arith.constant 0 : i32
    return %arg0, %arg1 : i32, i32
  }
  func.func @transform_1(%arg0: i32, %arg1: i32) -> (i32, i32) {
    %c0_i32 = arith.constant 0 : i32
    %c0_i32_0 = arith.constant 0 : i32
    return %arg1, %c0_i32 : i32, i32
  }
  func.func @transform_2(%arg0: i32, %arg1: i32) -> (i32, i32) {
    %c0_i32 = arith.constant 0 : i32
    %c0_i32_0 = arith.constant 0 : i32
    return %arg0, %c0_i32 : i32, i32
  }
  func.func @transform_3(%arg0: i32, %arg1: i32) -> (i32, i32) {
    %c0_i32 = arith.constant 0 : i32
    %c0_i32_0 = arith.constant 0 : i32
    return %arg0, %c0_i32 : i32, i32
  }
  func.func @transform_4(%arg0: i32, %arg1: i32) -> (i32, i32) {
    %c0_i32 = arith.constant 0 : i32
    %c0_i32_0 = arith.constant 0 : i32
    %c0_i32_1 = arith.constant 0 : i32
    return %c0_i32, %c0_i32_0 : i32, i32
  }
  func.func @transform_5(%arg0: i32, %arg1: i32) -> (i32, i32) {
    %c0_i32 = arith.constant 0 : i32
    %c0_i32_0 = arith.constant 0 : i32
    %c0_i32_1 = arith.constant 0 : i32
    return %c0_i32, %c0_i32_0 : i32, i32
  }
  func.func @transform_6(%arg0: i32, %arg1: i32) -> (i32, i32) {
    %c0_i32 = arith.constant 0 : i32
    %c0_i32_0 = arith.constant 0 : i32
    %c0_i32_1 = arith.constant 0 : i32
    return %c0_i32, %c0_i32_0 : i32, i32
  }
  func.func @transform_7(%arg0: i32, %arg1: i32) -> (i32, i32) {
    %c0_i32 = arith.constant 0 : i32
    %c0_i32_0 = arith.constant 0 : i32
    return %arg0, %c0_i32 : i32, i32
  }
}

</mosaic_0001>

<bundles_post_ra>
// kernel: tpu_custom_call.1
= control target key start
LH: loop header
LB: loop body
LE: loop exit
PB: predicated region body
PF: predicated region fallthrough
CT: control target
= control target key end

     0   :  { %12 = vsyncpa [#allocation4], 0  ;;  %s1868_s0 = inlined_call_operand.hbm [shape: bf16[128,128], index: 0, kind: input, shape index: {}]   ;;  %s1869_s1 = inlined_call_operand.hbm [shape: bf16[128,128], index: 1, kind: input, shape index: {}]   ;;  %s1870_s2 = inlined_call_operand.vmem [shape: f32[128,128], index: 2, kind: input, shape index: {}]   ;;  %s1871_s3 = inlined_call_operand.vmem [shape: f32[128,1], index: 3, kind: input, shape index: {}]   ;;  %s1872_s4 = inlined_call_operand.hbm [shape: f32[128,128], index: 4, kind: input, shape index: {}]   ;;  %s1873_s5 = inlined_call_operand.hbm [shape: f32[128,128], index: 5, kind: input, shape index: {}]   ;;  %s1874_s6 = inlined_call_operand.vmem [shape: f32[1,128], index: 6, kind: input, shape index: {}]   ;;  %s1875_s7 = inlined_call_operand.hbm [shape: bf16[128,128], index: 7, kind: output, shape index: {}]  }
   0x1   :  { %13 = vsyncpa [#allocation7], 0 }
   0x2   :  { %14 = vsyncpa [#allocation10], 0 }
   0x3   :  { %15 = vsyncpa [#allocation5], 0  ;;  %s1577_s24 = smov [#allocation6]   ;;  %s1578_s26 = smov [#allocation3]  }
   0x4   :  { %s33_s25 = sshll.u32 %s1577_s24, 4  ;;  %s21_s27 = sshll.u32 %s1578_s26, 4  ;;  %s34_s25 = int_to_ptr.vmem [resolvable:$true] %s33_s25  ;;  %s1627_s27 = int_to_ptr.vmem [resolvable:$true] %s21_s27 }
   0x5   :  { %s1459_s30 = scalar_lea.hbm %s1869_s1, 1024 }
   0x6   :  { %p1460_p0 = scmp.ne.s32.totalorder %s1869_s1, %s1459_s30  ;;  %p1463_p1 = scmp.lt.u32.totalorder %s1459_s30, %s1869_s1 }
   0x8   :  { %p1465_p2 = pnand %p1463_p1, %p1460_p0 }
   0xa   :  { %1468 = shalt.err (!%p1465_p2)
}
   0xb   :  { %s1469_s12 = scalar_lea.vmem %s34_s25, 1024  ;;  %p1474_p4 = scmp.lt.s32.totalorder %s34_s25, %s34_s25 }
   0xc   :  { %p1470_p3 = scmp.ne.s32.totalorder %s34_s25, %s1469_s12  ;;  %p1475_p5 = scmp.lt.s32.totalorder %s1469_s12, %s1469_s12 }
   0xe   :  { %p1476_p6 = por %p1475_p5, %p1474_p4 }
  0x10   :  { %p1477_p7 = pnand %p1476_p6, %p1470_p3 }
  0x12   :  { %1480 = shalt.err (!%p1477_p7)
}
  0x13   :  { %s1579_s13 = smov 64   ;;  %s1580_s14 = smov 4  }
  0x14   :  { %39 = dma.hbm_to_vmem [thread:$0]  %s1869_s1, 1024, %s34_s25, [#allocation7], %s1579_s13, %s1579_s13, %s1580_s14  }
  0x15   :  { %s1481_s19 = scalar_lea.hbm %s1868_s0, 1024 }
  0x16   :  { %p1482_p8 = scmp.ne.s32.totalorder %s1868_s0, %s1481_s19  ;;  %p1485_p9 = scmp.lt.u32.totalorder %s1481_s19, %s1868_s0 }
  0x18   :  { %p1487_p10 = pnand %p1485_p9, %p1482_p8 }
  0x1a   :  { %1490 = shalt.err (!%p1487_p10)
}
  0x1b   :  { %s1491_s24 = scalar_lea.vmem %s1627_s27, 1024  ;;  %p1496_p12 = scmp.lt.s32.totalorder %s1627_s27, %s1627_s27 }
  0x1c   :  { %p1492_p11 = scmp.ne.s32.totalorder %s1627_s27, %s1491_s24  ;;  %p1497_p13 = scmp.lt.s32.totalorder %s1491_s24, %s1491_s24 }
  0x1e   :  { %p1498_p0 = por %p1497_p13, %p1496_p12 }
  0x20   :  { %p1499_p1 = pnand %p1498_p0, %p1492_p11 }
  0x22   :  { %1502 = shalt.err (!%p1499_p1)
}
  0x23   :  { %27 = dma.hbm_to_vmem [thread:$0]  %s1868_s0, 1024, %s1627_s27, [#allocation4], %s1579_s13, %s1579_s13, %s1580_s14  }
  0x24   :  { %s1581_s26 = smov [#allocation8]   ;;  %s1503_s8 = scalar_lea.hbm %s1872_s4, 2048 }
  0x25   :  { %s49_s28 = sshll.u32 %s1581_s26, 4  ;;  %p1504_p2 = scmp.ne.s32.totalorder %s1872_s4, %s1503_s8  ;;  %s50_s28 = int_to_ptr.vmem [resolvable:$true] %s49_s28 }
  0x26   :  { %p1507_p3 = scmp.lt.u32.totalorder %s1503_s8, %s1872_s4 }
  0x28   :  { %p1509_p4 = pnand %p1507_p3, %p1504_p2 }
  0x2a   :  { %1512 = shalt.err (!%p1509_p4)
}
  0x2b   :  { %s1513_s15 = scalar_lea.vmem %s50_s28, 2048  ;;  %p1518_p6 = scmp.lt.s32.totalorder %s50_s28, %s50_s28 }
  0x2c   :  { %p1514_p5 = scmp.ne.s32.totalorder %s50_s28, %s1513_s15  ;;  %p1519_p7 = scmp.lt.s32.totalorder %s1513_s15, %s1513_s15 }
  0x2e   :  { %p1520_p8 = por %p1519_p7, %p1518_p6 }
  0x30   :  { %p1521_p9 = pnand %p1520_p8, %p1514_p5 }
  0x32   :  { %1524 = shalt.err (!%p1521_p9)
}
  0x33   :  { %s1582_s0 = smov 128   ;;  %s1583_s27 = smov 8  }
  0x34   :  { %55 = dma.hbm_to_vmem [thread:$0]  %s1872_s4, 2048, %s50_s28, [#allocation7], %s1582_s0, %s1582_s0, %s1583_s27  }
  0x35   :  { %s1584_s18 = smov [#allocation9]   ;;  %s1525_s22 = scalar_lea.hbm %s1873_s5, 2048 }
  0x36   :  { %s61_s19 = sshll.u32 %s1584_s18, 4  ;;  %p1526_p10 = scmp.ne.s32.totalorder %s1873_s5, %s1525_s22  ;;  %s62_s19 = int_to_ptr.vmem [resolvable:$true] %s61_s19 }
  0x37   :  { %p1529_p11 = scmp.lt.u32.totalorder %s1525_s22, %s1873_s5 }
  0x39   :  { %p1531_p12 = pnand %p1529_p11, %p1526_p10 }
  0x3b   :  { %1534 = shalt.err (!%p1531_p12)
}
  0x3c   :  { %s1535_s26 = scalar_lea.vmem %s62_s19, 2048  ;;  %p1540_p0 = scmp.lt.s32.totalorder %s62_s19, %s62_s19 }
  0x3d   :  { %p1536_p13 = scmp.ne.s32.totalorder %s62_s19, %s1535_s26  ;;  %p1541_p1 = scmp.lt.s32.totalorder %s1535_s26, %s1535_s26 }
  0x3f   :  { %p1542_p2 = por %p1541_p1, %p1540_p0 }
  0x41   :  { %p1543_p3 = pnand %p1542_p2, %p1536_p13 }
  0x43   :  { %1546 = shalt.err (!%p1543_p3)
}
  0x44   :  { %67 = dma.hbm_to_vmem [thread:$0]  %s1873_s5, 2048, %s62_s19, [#allocation10], %s1582_s0, %s1582_s0, %s1583_s27  }
  0x45   :  { %1569 = dma.done.wait [#allocation4], 1024  }
  0x46   :  { %1570 = vsyncadd [#allocation4], 4294966272 }
  0x47   :  { %1571 = dma.done.wait [#allocation7], 3072  }
  0x48   :  { %1572 = vsyncadd [#allocation7], 4294964224 }
  0x49   :  { %1573 = dma.done.wait [#allocation10], 2048  }
  0x4a   :  { %1574 = vsyncadd [#allocation10], 4294965248  ;;  %v1585_v0 = vmov 0   ;;  %v1411_v1 = vld [vmem:[#allocation6] sm:$0xff]   ;;  %v1412_v2 = vld [vmem:[#allocation6 + $0x8] sm:$0xff]  }
  0x4b   :  { %1409 = vset.pattern.permute.xlu0 %v1585_v0  ;;  %1410 = vset.pattern.permute.xlu1 %v1585_v0  ;;  %v1413_v3 = vld [vmem:[#allocation6 + $0x10] sm:$0xff]   ;;  %v1414_v4 = vld [vmem:[#allocation6 + $0x18] sm:$0xff]   ;;  %v1419_v5 = vld [vmem:[#allocation3] sm:$0xff]  }
  0x4c   :  { %1159 = vmatprep.subr.bf16.mxu0 %v1411_v1  ;;  %1175 = vmatprep.mubr.bf16.mxu0 %v1419_v5  ;;  %v1415_v6 = vld [vmem:[#allocation6 + $0x20] sm:$0xff]   ;;  %v1416_v7 = vld [vmem:[#allocation6 + $0x28] sm:$0xff]   ;;  %v397_v9 = vld [vmem:[%s1871_s3 + $0x10] sm:$0xff] }
  0x4d   :  { %1160 = vmatpush3.bf16.msra.mxu0 %v1411_v1  ;;  %v395_v8 = vld [vmem:[%s1871_s3] sm:$0xff]  ;;  %423 = vperm.xlu1 %1410, %v397_v9   ;;  %v396_v10 = vld [vmem:[%s1871_s3 + $0x8] sm:$0xff]  ;;  %v398_v11 = vld [vmem:[%s1871_s3 + $0x18] sm:$0xff] }
  0x4e   :  { %1161 = vmatprep.subr.bf16.mxu0 %v1412_v2  ;;  %413 = vperm.xlu0 %1409, %v395_v8   ;;  %v1417_v12 = vld [vmem:[#allocation6 + $0x30] sm:$0xff]   ;;  %v539_v13 = vld [vmem:[#allocation9] sm:$0xff]  ;;  %v540_v14 = vld [vmem:[#allocation9 + $0x8] sm:$0xff] }
  0x4f   :  { %v399_v15 = vld [vmem:[%s1871_s3 + $0x20] sm:$0xff]  ;;  %v400_v16 = vld [vmem:[%s1871_s3 + $0x28] sm:$0xff]  ;;  %v1303_v17 = vpack.c.bf16 %v540_v14, %v539_v13  ;;  %v541_v18 = vld [vmem:[#allocation9 + $0x10] sm:$0xff] }
  0x50   :  { %v542_v19 = vld [vmem:[#allocation9 + $0x18] sm:$0xff]  ;;  %v543_v22 = vld [vmem:[#allocation9 + $0x20] sm:$0xff]  ;;  %v544_v23 = vld [vmem:[#allocation9 + $0x28] sm:$0xff] }
  0x51   :  { %1162 = vmatpush3.bf16.msra.mxu0 %v1412_v2  ;;  %428 = vperm.xlu1 %1410, %v398_v11   ;;  %v1418_v20 = vld [vmem:[#allocation6 + $0x38] sm:$0xff]   ;;  %v1307_v21 = vpack.c.bf16 %v542_v19, %v541_v18  ;;  %v523_v24 = vld [vmem:[#allocation8] sm:$0xff]  ;;  %v524_v25 = vld [vmem:[#allocation8 + $0x8] sm:$0xff]  ;;  %v1311_v28 = vpack.c.bf16 %v544_v23, %v543_v22 }
  0x52   :  { %1163 = vmatprep.subr.bf16.mxu0 %v1413_v3  ;;  %418 = vperm.xlu0 %1409, %v396_v10   ;;  %v401_v26 = vld [vmem:[%s1871_s3 + $0x30] sm:$0xff]  ;;  %v402_v27 = vld [vmem:[%s1871_s3 + $0x38] sm:$0xff]  ;;  %v1712_v29 = vpack.c.bf16 %v524_v25, %v523_v24  ;;  %v1420_v34 = vld [vmem:[#allocation3 + $0x8] sm:$0xff]  }
  0x53   :  { %1304 = vmatprep.subr.bf16.mxu1 %v1303_v17  ;;  %v525_v30 = vld [vmem:[#allocation8 + $0x10] sm:$0xff]  ;;  %v526_v31 = vld [vmem:[#allocation8 + $0x18] sm:$0xff]  ;;  %v403_v35 = vld [vmem:[%s1871_s3 + $0x40] sm:$0xff] }
  0x54   :  { %1306 = vmatpush3.bf16.msra.mxu1 %v1303_v17  ;;  %v545_v32 = vld [vmem:[#allocation9 + $0x30] sm:$0xff]  ;;  %v546_v33 = vld [vmem:[#allocation9 + $0x38] sm:$0xff]  ;;  %v404_v36 = vld [vmem:[%s1871_s3 + $0x48] sm:$0xff]  ;;  %v1721_v38 = vpack.c.bf16 %v526_v31, %v525_v30 }
  0x55   :  { %1164 = vmatpush3.bf16.msra.mxu0 %v1413_v3  ;;  %438 = vperm.xlu1 %1410, %v400_v16   ;;  %v1421_v37 = vld [vmem:[#allocation3 + $0x10] sm:$0xff]   ;;  %v1315_v39 = vpack.c.bf16 %v546_v33, %v545_v32  ;;  %v547_v40 = vld [vmem:[#allocation9 + $0x40] sm:$0xff]  ;;  %v548_v41 = vld [vmem:[#allocation9 + $0x48] sm:$0xff] }
  0x56   :  { %1165 = vmatprep.subr.bf16.mxu0 %v1414_v4  ;;  %433 = vperm.xlu0 %1409, %v399_v15   ;;  %v527_v42 = vld [vmem:[#allocation8 + $0x20] sm:$0xff]  ;;  %v528_v43 = vld [vmem:[#allocation8 + $0x28] sm:$0xff]  ;;  %v405_v44 = vld [vmem:[%s1871_s3 + $0x50] sm:$0xff]  ;;  %v1319_v46 = vpack.c.bf16 %v548_v41, %v547_v40 }
  0x57   :  { %1308 = vmatprep.subr.bf16.mxu1 %v1307_v21  ;;  %v406_v45 = vld [vmem:[%s1871_s3 + $0x58] sm:$0xff]  ;;  %v1731_v47 = vpack.c.bf16 %v528_v43, %v527_v42  ;;  %v529_v48 = vld [vmem:[#allocation8 + $0x30] sm:$0xff]  ;;  %v407_v53 = vld [vmem:[%s1871_s3 + $0x60] sm:$0xff] }
  0x58   :  { %1310 = vmatpush3.bf16.msra.mxu1 %v1307_v21  ;;  %v530_v49 = vld [vmem:[#allocation8 + $0x38] sm:$0xff]  ;;  %v549_v50 = vld [vmem:[#allocation9 + $0x50] sm:$0xff]  ;;  %v408_v54 = vld [vmem:[%s1871_s3 + $0x68] sm:$0xff] }
  0x59   :  { %1166 = vmatpush3.bf16.msra.mxu0 %v1414_v4  ;;  %448 = vperm.xlu1 %1410, %v402_v27   ;;  %v550_v51 = vld [vmem:[#allocation9 + $0x58] sm:$0xff]  ;;  %v1423_v55 = vld [vmem:[#allocation3 + $0x20] sm:$0xff]   ;;  %v1741_v56 = vpack.c.bf16 %v530_v49, %v529_v48  ;;  %v552_v59 = vld [vmem:[#allocation9 + $0x68] sm:$0xff] }
  0x5a   :  { %1167 = vmatprep.subr.bf16.mxu0 %v1415_v6  ;;  %443 = vperm.xlu0 %1409, %v401_v26   ;;  %v1422_v52 = vld [vmem:[#allocation3 + $0x18] sm:$0xff]   ;;  %v1323_v57 = vpack.c.bf16 %v550_v51, %v549_v50  ;;  %v551_v58 = vld [vmem:[#allocation9 + $0x60] sm:$0xff]  ;;  %v532_v61 = vld [vmem:[#allocation8 + $0x48] sm:$0xff] }
  0x5b   :  { %1312 = vmatprep.subr.bf16.mxu1 %v1311_v28  ;;  %v531_v60 = vld [vmem:[#allocation8 + $0x40] sm:$0xff]  ;;  %v409_v62 = vld [vmem:[%s1871_s3 + $0x70] sm:$0xff]  ;;  %v410_v63 = vld [vmem:[%s1871_s3 + $0x78] sm:$0xff]  ;;  %v1327_v0 = vpack.c.bf16 %v552_v59, %v551_v58 }
  0x5c   :  { %1314 = vmatpush3.bf16.msra.mxu1 %v1311_v28  ;;  %v1751_v1 = vpack.c.bf16 %v532_v61, %v531_v60  ;;  %v533_v2 = vld [vmem:[#allocation8 + $0x50] sm:$0xff]  ;;  %v534_v3 = vld [vmem:[#allocation8 + $0x58] sm:$0xff]  ;;  %v1424_v4 = vld [vmem:[#allocation3 + $0x28] sm:$0xff]  }
  0x5d   :  { %1168 = vmatpush3.bf16.msra.mxu0 %v1415_v6  ;;  %458 = vperm.xlu1 %1410, %v404_v36   ;;  %v1425_v5 = vld [vmem:[#allocation3 + $0x30] sm:$0xff]   ;;  %v1755_v6 = vpack.c.bf16 %v534_v3, %v533_v2  ;;  %v536_v8 = vld [vmem:[#allocation8 + $0x68] sm:$0xff]  ;;  %v1426_v10 = vld [vmem:[#allocation3 + $0x38] sm:$0xff]  }
  0x5e   :  { %1169 = vmatprep.subr.bf16.mxu0 %v1416_v7  ;;  %453 = vperm.xlu0 %1409, %v403_v35   ;;  %v553_v11 = vld [vmem:[#allocation9 + $0x70] sm:$0xff]  ;;  %v538_v15 = vld [vmem:[#allocation8 + $0x78] sm:$0xff]  ;;  %v507_v17 = vld [vmem:[%s1870_s2] sm:$0xff] }
  0x5f   :  { %1316 = vmatprep.subr.bf16.mxu1 %v1315_v39  ;;  %v537_v13 = vld [vmem:[#allocation8 + $0x70] sm:$0xff]  ;;  %v508_v18 = vld [vmem:[%s1870_s2 + $0x8] sm:$0xff]  ;;  %v511_v21 = vld [vmem:[%s1870_s2 + $0x20] sm:$0xff] }
  0x60   :  { %1318 = vmatpush3.bf16.msra.mxu1 %v1315_v39  ;;  %v1764_v16 = vpack.c.bf16 %v538_v15, %v537_v13  ;;  %v509_v19 = vld [vmem:[%s1870_s2 + $0x10] sm:$0xff]  ;;  %v512_v22 = vld [vmem:[%s1870_s2 + $0x28] sm:$0xff]  ;;  %v514_v24 = vld [vmem:[%s1870_s2 + $0x38] sm:$0xff] }
  0x61   :  { %1170 = vmatpush3.bf16.msra.mxu0 %v1416_v7  ;;  %468 = vperm.xlu1 %1410, %v406_v45   ;;  %v535_v7 = vld [vmem:[#allocation8 + $0x60] sm:$0xff]  ;;  %v513_v23 = vld [vmem:[%s1870_s2 + $0x30] sm:$0xff] }
  0x62   :  { %1171 = vmatprep.subr.bf16.mxu0 %v1417_v12  ;;  %463 = vperm.xlu0 %1409, %v405_v44   ;;  %v1759_v9 = vpack.c.bf16 %v536_v8, %v535_v7  ;;  %v519_v13 = vld [vmem:[%s1870_s2 + $0x60] sm:$0xff]  ;;  %v521_v15 = vld [vmem:[%s1870_s2 + $0x70] sm:$0xff] }
  0x63   :  { %1320 = vmatprep.subr.bf16.mxu1 %v1319_v46 }
  0x64   :  { %1322 = vmatpush3.bf16.msra.mxu1 %v1319_v46 }
  0x65   :  { %1172 = vmatpush3.bf16.msra.mxu0 %v1417_v12  ;;  %478 = vperm.xlu1 %1410, %v408_v54   ;;  %v554_v12 = vld [vmem:[#allocation9 + $0x78] sm:$0xff] }
  0x66   :  { %1173 = vmatprep.subr.bf16.mxu0 %v1418_v20  ;;  %473 = vperm.xlu0 %1409, %v407_v53   ;;  %v1331_v14 = vpack.c.bf16 %v554_v12, %v553_v11  ;;  %v515_v11 = vld [vmem:[%s1870_s2 + $0x40] sm:$0xff]  ;;  %v518_v12 = vld [vmem:[%s1870_s2 + $0x58] sm:$0xff] }
  0x67   :  { %1324 = vmatprep.subr.bf16.mxu1 %v1323_v57 }
  0x68   :  { %1326 = vmatpush3.bf16.msra.mxu1 %v1323_v57 }
  0x69   :  { %1174 = vmatpush3.bf16.msra.mxu0 %v1418_v20  ;;  %488 = vperm.xlu1 %1410, %v410_v63   ;;  %v510_v20 = vld [vmem:[%s1870_s2 + $0x18] sm:$0xff] }
  0x6a   :  { %1336 = vmatprep.subr.bf16.mxu0 %v1712_v29  ;;  %483 = vperm.xlu0 %1409, %v409_v62  }
  0x6b   :  { %1328 = vmatprep.subr.bf16.mxu1 %v1327_v0 }
  0x6c   :  { %1176 = vmatmul.mubr.bf16.vlgmr.msra.gmra.mrb[0].mxu0 %v1420_v34  ;;  %1330 = vmatpush3.bf16.msra.mxu1 %v1327_v0 }
  0x6d   :  { %1179 = vmatprep.mubr.bf16.mxu0 %v1421_v37  ;;  %1338 = vmatpush3.bf16.msra.mxu0 %v1712_v29 }
  0x6e   :  { %1340 = vmatprep.subr.bf16.mxu0 %v1721_v38  ;;  %1332 = vmatprep.subr.bf16.mxu1 %v1331_v14 }
  0x70   :  { %1334 = vmatpush3.bf16.msra.mxu1 %v1331_v14  ;;  %v520_v14 = vld [vmem:[%s1870_s2 + $0x68] sm:$0xff] }
  0x71   :  { %1342 = vmatpush3.bf16.msra.mxu0 %v1721_v38  ;;  %1367 = vmatprep.subr.bf16.mxu1 %v1712_v29 }
  0x72   :  { %1344 = vmatprep.subr.bf16.mxu0 %v1731_v47 }
  0x74   :  { %1180 = vmatmul.mubr.bf16.gmra.mrb[4].mxu0 %v1422_v52 }
  0x75   :  { %1183 = vmatprep.mubr.bf16.mxu0 %v1423_v55  ;;  %1346 = vmatpush3.bf16.msra.mxu0 %v1731_v47 }
  0x76   :  { %1348 = vmatprep.subr.bf16.mxu0 %v1741_v56 }
  0x79   :  { %1350 = vmatpush3.bf16.msra.mxu0 %v1741_v56 }
  0x7a   :  { %1352 = vmatprep.subr.bf16.mxu0 %v1751_v1 }
  0x7c   :  { %1184 = vmatmul.mubr.bf16.gmra.mrb[8].mxu0 %v1424_v4 }
  0x7d   :  { %1187 = vmatprep.mubr.bf16.mxu0 %v1425_v5  ;;  %1354 = vmatpush3.bf16.msra.mxu0 %v1751_v1 }
  0x7e   :  { %1356 = vmatprep.subr.bf16.mxu0 %v1755_v6 }
  0x81   :  { %1358 = vmatpush3.bf16.msra.mxu0 %v1755_v6 }
  0x82   :  { %1360 = vmatprep.subr.bf16.mxu0 %v1759_v9 }
  0x84   :  { %1188 = vmatmul.mubr.bf16.gmra.mrb[12].mxu0 %v1426_v10 }
  0x85   :  { %1362 = vmatpush3.bf16.msra.mxu0 %v1759_v9  ;;  %1279 = vmatprep.mubr.f32.mxu0 %v507_v17 }
  0x86   :  { %1364 = vmatprep.subr.bf16.mxu0 %v1764_v16 }
  0x89   :  { %1366 = vmatpush3.bf16.msra.mxu0 %v1764_v16 }
  0x8c   :  { %1280 = vmatmul.mubr.f32.vlgmr.msra.gmra.mrb[16].mxu0 %v508_v18 }
  0x8d   :  { %1282 = vmatprep.mubr.f32.mxu0 %v509_v19 }
  0x90   :  { %1283 = vmatmul.mubr.f32.gmra.mrb[18].mxu0 %v510_v20 }
  0x91   :  { %1285 = vmatprep.mubr.f32.mxu0 %v511_v21 }
  0x94   :  { %1286 = vmatmul.mubr.f32.gmra.mrb[20].mxu0 %v512_v22 }
  0x95   :  { %1288 = vmatprep.mubr.f32.mxu0 %v513_v23 }
  0x98   :  { %1289 = vmatmul.mubr.f32.gmra.mrb[22].mxu0 %v514_v24 }
  0xcc   :  { %v424_v26 = vpop.permute.xlu1 %423 }
  0xcd   :  { %v414_v25 = vpop.permute.xlu0 %413 }
  0xd0   :  { %v429_v28 = vpop.permute.xlu1 %428 }
  0xd1   :  { %v419_v27 = vpop.permute.xlu0 %418 }
  0xd4   :  { %v439_v32 = vpop.permute.xlu1 %438 }
  0xd5   :  { %v434_v30 = vpop.permute.xlu0 %433 }
  0xd8   :  { %v449_v41 = vpop.permute.xlu1 %448 }
  0xd9   :  { %v444_v37 = vpop.permute.xlu0 %443 }
  0xdc   :  { %v459_v51 = vpop.permute.xlu1 %458 }
  0xdd   :  { %v454_v45 = vpop.permute.xlu0 %453 }
 0x13f   :  { %v1177_v31 = vpop.f32.mrb[0].mxu0 }
 0x140   :  { %v281_v33 = vpop.f32.mrb[1].mxu0  ;;  %v493_v40 = vmul.f32 %v1177_v31, %v424_v26  ;;  %v1835_v26 = vld [vmem:[%s1874_s6] ss:$0 sm:$0xff] }
 0x141   :  { %v1178_v34 = vpop.f32.mrb[2].mxu0  ;;  %v491_v35 = vmul.f32 %v414_v25, %v281_v33 }
 0x142   :  { %v284_v36 = vpop.f32.mrb[3].mxu0  ;;  %v494_v42 = vmul.f32 %v1178_v34, %v429_v28 }
 0x143   :  { %v492_v39 = vmul.f32 %v419_v27, %v284_v36  ;;  %1223 = vmatprep.mubr.f32.mxu1 %v491_v35 }
 0x145   :  { %1224 = vmatmul.mubr.f32.vlgmr.msra.gmra.mrb[0].mxu1 %v492_v39 }
 0x146   :  { %1375 = vmatpush3.bf16.msra.mxu1 %v1712_v29  ;;  %1226 = vmatprep.mubr.f32.mxu1 %v493_v40  ;;  %v464_v29 = vpop.permute.xlu0 %463 }
 0x147   :  { %v1181_v43 = vpop.f32.mrb[4].mxu0  ;;  %1368 = vmatprep.subr.bf16.mxu1 %v1721_v38 }
 0x148   :  { %v297_v44 = vpop.f32.mrb[5].mxu0  ;;  %v497_v52 = vmul.f32 %v1181_v43, %v444_v37 }
 0x149   :  { %v495_v46 = vmul.f32 %v434_v30, %v297_v44  ;;  %v1182_v48 = vpop.f32.mrb[6].mxu0  ;;  %1227 = vmatmul.mubr.f32.gmra.mrb[2].mxu1 %v494_v42 }
 0x14a   :  { %1376 = vmatpush3.bf16.msra.mxu1 %v1721_v38  ;;  %v300_v49 = vpop.f32.mrb[7].mxu0  ;;  %v498_v53 = vmul.f32 %v1182_v48, %v449_v41  ;;  %v469_v38 = vpop.permute.xlu1 %468 }
 0x14b   :  { %v496_v50 = vmul.f32 %v439_v32, %v300_v49  ;;  %1229 = vmatprep.mubr.f32.mxu1 %v495_v46  ;;  %1369 = vmatprep.subr.bf16.mxu1 %v1731_v47 }
 0x14d   :  { %1230 = vmatmul.mubr.f32.gmra.mrb[4].mxu1 %v496_v50 }
 0x14e   :  { %1377 = vmatpush3.bf16.msra.mxu1 %v1731_v47  ;;  %1232 = vmatprep.mubr.f32.mxu1 %v497_v52  ;;  %v474_v47 = vpop.permute.xlu0 %473  ;;  %v479_v0 = vpop.permute.xlu1 %478 }
 0x14f   :  { %v1185_v54 = vpop.f32.mrb[8].mxu0  ;;  %1370 = vmatprep.subr.bf16.mxu1 %v1741_v56 }
 0x150   :  { %v313_v55 = vpop.f32.mrb[9].mxu0  ;;  %v501_v61 = vmul.f32 %v1185_v54, %v464_v29 }
 0x151   :  { %v499_v57 = vmul.f32 %v454_v45, %v313_v55  ;;  %v1186_v58 = vpop.f32.mrb[10].mxu0  ;;  %1233 = vmatmul.mubr.f32.gmra.mrb[6].mxu1 %v498_v53 }
 0x152   :  { %1378 = vmatpush3.bf16.msra.mxu1 %v1741_v56  ;;  %v316_v59 = vpop.f32.mrb[11].mxu0  ;;  %v502_v62 = vmul.f32 %v1186_v58, %v469_v38  ;;  %v484_v5 = vpop.permute.xlu0 %483 }
 0x153   :  { %v500_v60 = vmul.f32 %v459_v51, %v316_v59  ;;  %1235 = vmatprep.mubr.f32.mxu1 %v499_v57  ;;  %1371 = vmatprep.subr.bf16.mxu1 %v1751_v1 }
 0x155   :  { %1236 = vmatmul.mubr.f32.gmra.mrb[8].mxu1 %v500_v60 }
 0x156   :  { %1379 = vmatpush3.bf16.msra.mxu1 %v1751_v1  ;;  %1238 = vmatprep.mubr.f32.mxu1 %v501_v61  ;;  %v489_v1 = vpop.permute.xlu1 %488 }
 0x157   :  { %v1189_v63 = vpop.f32.mrb[12].mxu0  ;;  %1372 = vmatprep.subr.bf16.mxu1 %v1755_v6 }
 0x158   :  { %v329_v2 = vpop.f32.mrb[13].mxu0  ;;  %v505_v8 = vmul.f32 %v1189_v63, %v484_v5 }
 0x159   :  { %v503_v3 = vmul.f32 %v474_v47, %v329_v2  ;;  %v1190_v4 = vpop.f32.mrb[14].mxu0  ;;  %1239 = vmatmul.mubr.f32.gmra.mrb[10].mxu1 %v502_v62 }
 0x15a   :  { %1380 = vmatpush3.bf16.msra.mxu1 %v1755_v6  ;;  %v332_v56 = vpop.f32.mrb[15].mxu0  ;;  %v506_v10 = vmul.f32 %v1190_v4, %v489_v1  ;;  %v516_v6 = vld [vmem:[%s1870_s2 + $0x48] sm:$0xff] }
 0x15b   :  { %v504_v7 = vmul.f32 %v479_v0, %v332_v56  ;;  %1241 = vmatprep.mubr.f32.mxu1 %v503_v3  ;;  %1373 = vmatprep.subr.bf16.mxu1 %v1759_v9 }
 0x15d   :  { %1242 = vmatmul.mubr.f32.gmra.mrb[12].mxu1 %v504_v7 }
 0x15e   :  { %1381 = vmatpush3.bf16.msra.mxu1 %v1759_v9  ;;  %1244 = vmatprep.mubr.f32.mxu1 %v505_v8  ;;  %v517_v9 = vld [vmem:[%s1870_s2 + $0x50] sm:$0xff] }
 0x15f   :  { %1374 = vmatprep.subr.bf16.mxu1 %v1764_v16  ;;  %v1281_v17 = vpop.f32.mrb[16].mxu0 }
 0x160   :  { %v766_v18 = vpop.f32.mrb[17].mxu0 }
 0x161   :  { %1245 = vmatmul.mubr.f32.gmra.mrb[14].mxu1 %v506_v10 }
 0x162   :  { %1382 = vmatpush3.bf16.msra.mxu1 %v1764_v16  ;;  %1291 = vmatprep.mubr.f32.mxu1 %v515_v11  ;;  %v522_v16 = vld [vmem:[%s1870_s2 + $0x78] sm:$0xff]  ;;  %s1586_s2 = smov [#allocation11]  }
 0x163   :  { %v1284_v19 = vpop.f32.mrb[18].mxu0  ;;  %s969_s6 = sshll.u32 %s1586_s2, 4  ;;  %s970_s6 = int_to_ptr.vmem [resolvable:$true] %s969_s6 }
 0x164   :  { %v776_v20 = vpop.f32.mrb[19].mxu0  ;;  %s1547_s19 = scalar_lea.vmem %s970_s6, 1024  ;;  %p1552_p5 = scmp.lt.s32.totalorder %s970_s6, %s970_s6 }
 0x165   :  { %1292 = vmatmul.mubr.f32.vlgmr.msra.gmra.mrb[8].mxu1 %v516_v6  ;;  %p1548_p4 = scmp.ne.s32.totalorder %s970_s6, %s1547_s19  ;;  %p1553_p6 = scmp.lt.s32.totalorder %s1547_s19, %s1547_s19 }
 0x166   :  { %1294 = vmatprep.mubr.f32.mxu1 %v517_v9 }
 0x167   :  { %v1287_v21 = vpop.f32.mrb[20].mxu0  ;;  %p1554_p7 = por %p1553_p6, %p1552_p5 }
 0x168   :  { %v786_v22 = vpop.f32.mrb[21].mxu0 }
 0x169   :  { %1295 = vmatmul.mubr.f32.gmra.mrb[10].mxu1 %v518_v12  ;;  %p1555_p8 = pnand %p1554_p7, %p1548_p4 }
 0x16a   :  { %1297 = vmatprep.mubr.f32.mxu1 %v519_v13 }
 0x16b   :  { %v1290_v23 = vpop.f32.mrb[22].mxu0 }
 0x16c   :  { %v796_v24 = vpop.f32.mrb[23].mxu0 }
 0x16d   :  { %1298 = vmatmul.mubr.f32.gmra.mrb[12].mxu1 %v520_v14 }
 0x16e   :  { %1300 = vmatprep.mubr.f32.mxu1 %v521_v15 }
 0x171   :  { %1301 = vmatmul.mubr.f32.gmra.mrb[14].mxu1 %v522_v16 }
 0x218   :  { %v1225_v25 = vpop.f32.mrb[0].mxu1 }
 0x219   :  { %v772_v27 = vadd.f32 %v1281_v17, %v1225_v25  ;;  %v621_v28 = vpop.f32.mrb[1].mxu1 }
 0x21a   :  { %v767_v30 = vadd.f32 %v766_v18, %v621_v28 }
 0x21b   :  { %v853_v31 = vadd.f32 %v1835_v26, %v772_v27 }
 0x21c   :  { %v852_v32 = vadd.f32 %v1835_v26, %v767_v30  ;;  %v1228_v33 = vpop.f32.mrb[2].mxu1 }
 0x21d   :  { %1427 = vtanh.f32 %v853_v31  ;;  %v782_v34 = vadd.f32 %v1284_v19, %v1228_v33  ;;  %v631_v35 = vpop.f32.mrb[3].mxu1 }
 0x21e   :  { %1429 = vtanh.f32 %v852_v32  ;;  %v777_v36 = vadd.f32 %v776_v20, %v631_v35 }
 0x21f   :  { %v855_v37 = vadd.f32 %v1835_v26, %v782_v34 }
 0x220   :  { %v854_v39 = vadd.f32 %v1835_v26, %v777_v36  ;;  %v1231_v40 = vpop.f32.mrb[4].mxu1 }
 0x221   :  { %1431 = vtanh.f32 %v855_v37  ;;  %v792_v41 = vadd.f32 %v1287_v21, %v1231_v40  ;;  %v641_v42 = vpop.f32.mrb[5].mxu1 }
 0x222   :  { %1433 = vtanh.f32 %v854_v39  ;;  %v787_v43 = vadd.f32 %v786_v22, %v641_v42 }
 0x223   :  { %v857_v44 = vadd.f32 %v1835_v26, %v792_v41 }
 0x224   :  { %v856_v45 = vadd.f32 %v1835_v26, %v787_v43  ;;  %v1234_v46 = vpop.f32.mrb[6].mxu1 }
 0x225   :  { %1435 = vtanh.f32 %v857_v44  ;;  %v802_v48 = vadd.f32 %v1290_v23, %v1234_v46  ;;  %v651_v49 = vpop.f32.mrb[7].mxu1 }
 0x226   :  { %1437 = vtanh.f32 %v856_v45  ;;  %v797_v50 = vadd.f32 %v796_v24, %v651_v49 }
 0x227   :  { %v1428_v51 = vpop.eup %1427  ;;  %v859_v52 = vadd.f32 %v1835_v26, %v802_v48 }
 0x228   :  { %v1430_v29 = vpop.eup %1429  ;;  %v858_v53 = vadd.f32 %v1835_v26, %v797_v50 }
 0x229   :  { %v1035_v54 = vpack.c.bf16 %v1428_v51, %v1430_v29  ;;  %1439 = vtanh.f32 %v859_v52 }
 0x22a   :  { %1441 = vtanh.f32 %v858_v53 }
 0x22b   :  { %v1432_v55 = vpop.eup %1431  ;;  %1036 = vst [vmem:[#allocation11] sm:$0xff] %v1035_v54  }
 0x22c   :  { %v1434_v57 = vpop.eup %1433 }
 0x22d   :  { %v1040_v58 = vpack.c.bf16 %v1432_v55, %v1434_v57 }
 0x22f   :  { %v1436_v38 = vpop.eup %1435  ;;  %1072 = vst [vmem:[#allocation11 + $0x8] sm:$0xff] %v1040_v58  }
 0x230   :  { %v1438_v59 = vpop.eup %1437 }
 0x231   :  { %v1045_v60 = vpack.c.bf16 %v1436_v38, %v1438_v59 }
 0x233   :  { %v1440_v61 = vpop.eup %1439  ;;  %1073 = vst [vmem:[#allocation11 + $0x10] sm:$0xff] %v1045_v60  }
 0x234   :  { %v1442_v47 = vpop.eup %1441 }
 0x235   :  { %v1050_v62 = vpack.c.bf16 %v1440_v61, %v1442_v47 }
 0x237   :  { %1074 = vst [vmem:[#allocation11 + $0x18] sm:$0xff] %v1050_v62  }
 0x238   :  { %v1293_v63 = vpop.f32.mrb[8].mxu1 }
 0x239   :  { %v861_v0 = vadd.f32 %v1293_v63, %v1835_v26  ;;  %v806_v2 = vpop.f32.mrb[9].mxu1 }
 0x23a   :  { %v860_v3 = vadd.f32 %v1835_v26, %v806_v2 }
 0x23b   :  { %1443 = vtanh.f32 %v861_v0 }
 0x23c   :  { %1445 = vtanh.f32 %v860_v3  ;;  %v1296_v4 = vpop.f32.mrb[10].mxu1 }
 0x23d   :  { %v863_v56 = vadd.f32 %v1296_v4, %v1835_v26  ;;  %v816_v5 = vpop.f32.mrb[11].mxu1 }
 0x23e   :  { %v862_v7 = vadd.f32 %v1835_v26, %v816_v5 }
 0x23f   :  { %1447 = vtanh.f32 %v863_v56 }
 0x240   :  { %1449 = vtanh.f32 %v862_v7  ;;  %v1299_v8 = vpop.f32.mrb[12].mxu1 }
 0x241   :  { %v865_v1 = vadd.f32 %v1299_v8, %v1835_v26  ;;  %v826_v10 = vpop.f32.mrb[13].mxu1 }
 0x242   :  { %v864_v11 = vadd.f32 %v1835_v26, %v826_v10 }
 0x243   :  { %1451 = vtanh.f32 %v865_v1 }
 0x244   :  { %1453 = vtanh.f32 %v864_v11  ;;  %v1302_v6 = vpop.f32.mrb[14].mxu1 }
 0x245   :  { %v1444_v9 = vpop.eup %1443  ;;  %v867_v12 = vadd.f32 %v1302_v6, %v1835_v26  ;;  %v836_v13 = vpop.f32.mrb[15].mxu1 }
 0x246   :  { %v1446_v14 = vpop.eup %1445  ;;  %v866_v15 = vadd.f32 %v1835_v26, %v836_v13 }
 0x247   :  { %v1055_v16 = vpack.c.bf16 %v1444_v9, %v1446_v14  ;;  %1455 = vtanh.f32 %v867_v12 }
 0x248   :  { %1457 = vtanh.f32 %v866_v15 }
 0x249   :  { %v1448_v17 = vpop.eup %1447  ;;  %1075 = vst [vmem:[#allocation11 + $0x20] sm:$0xff] %v1055_v16  }
 0x24a   :  { %v1450_v18 = vpop.eup %1449 }
 0x24b   :  { %v1060_v19 = vpack.c.bf16 %v1448_v17, %v1450_v18 }
 0x24d   :  { %v1452_v20 = vpop.eup %1451  ;;  %1076 = vst [vmem:[#allocation11 + $0x28] sm:$0xff] %v1060_v19  }
 0x24e   :  { %v1454_v21 = vpop.eup %1453 }
 0x24f   :  { %v1065_v22 = vpack.c.bf16 %v1452_v20, %v1454_v21 }
 0x251   :  { %v1456_v23 = vpop.eup %1455  ;;  %1077 = vst [vmem:[#allocation11 + $0x30] sm:$0xff] %v1065_v22  }
 0x252   :  { %v1458_v24 = vpop.eup %1457 }
 0x253   :  { %v1070_v25 = vpack.c.bf16 %v1456_v23, %v1458_v24 }
 0x255   :  { %1078 = vst [vmem:[#allocation11 + $0x38] sm:$0xff] %v1070_v25  }
 0x256   :  { %1558 = shalt.err (!%p1555_p8)
}
 0x257   :  { %s1559_s22 = scalar_lea.hbm %s1875_s7, 1024 }
 0x258   :  { %p1560_p9 = scmp.ne.s32.totalorder %s1875_s7, %s1559_s22  ;;  %p1563_p10 = scmp.lt.u32.totalorder %s1559_s22, %s1875_s7 }
 0x25a   :  { %p1565_p11 = pnand %p1563_p10, %p1560_p9 }
 0x25c   :  { %1568 = shalt.err (!%p1565_p11)
}
 0x25d   :  { %975 = dma.vmem_to_hbm [thread:$0]  %s970_s6, 1024, %s1875_s7, [#allocation5], %s1579_s13, %s1579_s13, %s1580_s14  }
 0x25e   :  { %1575 = dma.done.wait [#allocation5], 1024  }
 0x25f   :  { %1576 = vsyncadd [#allocation5], 4294966272 }
 0x260   :  { %979 = vsyncpa [#allocation4], 1 }
 0x261   :  { %980 = vsyncpa [#allocation7], 1 }
 0x262   :  { %981 = vsyncpa [#allocation10], 1 }
 0x263   :  { %982 = vsyncpa [#allocation5], 1 }

</bundles_post_ra>
